<compile_context>
chip_gen: v6e
topology: v6e:2x2x1
jax: 0.10.0
libtpu: 0.0.40
codegen_flags: <defaults>
</compile_context>

<pallas_src>
import functools
import math

import jax
import jax.numpy as jnp
from jax.experimental import pallas as pl
from jax.experimental.pallas import tpu as pltpu


def _round_up(v, m):
    return (v + m - 1) // m * m


def _vmem_budget_bytes():
    """~75% of physical per-core VMEM (generation aware), capped at 100 MiB."""
    cap = None
    try:
        info = pltpu.get_tpu_info()
        cap = getattr(info, "vmem_capacity_bytes", None)
    except Exception:
        cap = None
    if not cap:
        cap = 64 * 1024 * 1024          # conservative default (v7x per-TC VMEM)
    return min(int(cap) * 3 // 4, 100 * 1024 * 1024)


# ------------------------------------------------------------------ kernels
def _linear_kernel(x_ref, wt_ref, o_ref):
    # xw = x @ W^T  (W pre-transposed in wrapper; bf16 operands, f32 accumulate).
    o_ref[...] = jnp.dot(
        x_ref[...], wt_ref[...], preferred_element_type=jnp.float32
    ).astype(o_ref.dtype)


def _agg_bias_relu_kernel(adj_ref, h_ref, b_ref, o_ref, *, t, feat_resident):
    # out = relu(adj @ h + b), h = x @ W^T precomputed (linear-first order).
    # Accumulates directly into the resident f32 output block (no scratch).
    k = pl.program_id(1)

    @pl.when(k == 0)
    def _():
        o_ref[...] = jnp.zeros_like(o_ref)

    a = adj_ref[...].astype(jnp.bfloat16)
    if feat_resident:
        h = h_ref[pl.ds(pl.multiple_of(k * t, 128), t), :]
    else:
        h = h_ref[...]
    o_ref[...] += jnp.dot(a, h, preferred_element_type=jnp.float32)

    @pl.when(k == pl.num_programs(1) - 1)
    def _():
        o_ref[...] = jnp.maximum(o_ref[...] + b_ref[...], 0.0)


def _agg_linear_bias_relu_kernel(adj_ref, x_ref, wt_ref, b_ref, o_ref, acc_ref, *,
                                 t, feat_resident):
    # out = relu((adj @ x) @ W^T + b) (aggregate-first order, used when in_p < out_p).
    k = pl.program_id(1)

    @pl.when(k == 0)
    def _():
        acc_ref[...] = jnp.zeros_like(acc_ref)

    a = adj_ref[...].astype(jnp.bfloat16)
    if feat_resident:
        xb = x_ref[pl.ds(pl.multiple_of(k * t, 128), t), :]
    else:
        xb = x_ref[...]
    acc_ref[...] += jnp.dot(a, xb, preferred_element_type=jnp.float32)

    @pl.when(k == pl.num_programs(1) - 1)
    def _():
        h = jnp.dot(acc_ref[...].astype(wt_ref.dtype), wt_ref[...],
                    preferred_element_type=jnp.float32) + b_ref[...]
        o_ref[...] = jnp.maximum(h, 0.0)


# ------------------------------------------------------------------ wrapper
def gcn_layer(x, adj, weight, bias, *, max_tile=512):
    """x: [N, in_feats], adj: [N, N], weight: [out_feats, in_feats], bias: [out_feats]."""
    N, in_feats = x.shape
    out_feats = weight.shape[0]
    f32, bf16 = jnp.float32, jnp.bfloat16

    in_p = _round_up(in_feats, 128)
    out_p = _round_up(out_feats, 128)
    N_p = _round_up(N, 128)        # pad to 128 only (not to the row tile)

    budget = _vmem_budget_bytes()

    # adjacency stream: skip the O(N^2) wrapper pad/cast pass when already aligned.
    if N_p == N:
        adj_in = adj                               # native dtype; tiles cast in-kernel
        adj_esize = adj.dtype.itemsize
    else:
        adj_in = jnp.zeros((N_p, N_p), bf16).at[:N, :N].set(adj.astype(bf16))
        adj_esize = 2

    # small operands: pad once (cheap, O(N*feat)); weight pre-transposed, bf16.
    if (N, in_feats) == (N_p, in_p):
        x_b = x.astype(bf16)
    else:
        x_b = jnp.zeros((N_p, in_p), bf16).at[:N, :in_feats].set(x.astype(bf16))
    wt_b = jnp.zeros((in_p, out_p), bf16).at[:in_feats, :out_feats].set(
        weight.T.astype(bf16))
    b_p = jnp.zeros((1, out_p), f32).at[0, :out_feats].set(bias.astype(f32))

    # VMEM working-set model (conservative: 2 buffers per operand).
    def main_ws(t, feat_w, feat_resident, agg_first):
        ws = 2 * t * t * adj_esize                                  # adj stream
        ws += (2 * N_p * feat_w * 2) if feat_resident else (2 * t * feat_w * 2)
        ws += 2 * out_p * 4                                         # bias
        ws += 2 * t * out_p * 4                                     # f32 output block
        if agg_first:
            ws += 2 * in_p * out_p * 2                              # resident bf16 W^T
            ws += t * in_p * 4                                      # f32 accumulator
        return ws

    # Matmul order: contract the narrower feature dim in the O(N^2) matmul, but only
    # if the aggregate-first epilogue's resident weight fits VMEM.
    agg_first = out_p > in_p
    if agg_first and main_ws(128, in_p, False, True) > budget:
        agg_first = False  # TODO(synk): tile W over out_p instead of falling back
    feat_w = in_p if agg_first else out_p

    # Row/column tile for adj: must divide N_p; prefer >=2 row tiles (v7x megacore).
    cands = [c for c in (512, 384, 256, 128) if c <= max_tile and N_p % c == 0]
    cands = cands or [128]
    t = None
    for need_two in (True, False):
        for c in cands:
            if need_two and N_p // c < 2:
                continue
            if main_ws(c, feat_w, False, agg_first) <= budget:
                t = c
                break
        if t is not None:
            break
    if t is None:
        t = cands[-1]
    n_row = N_p // t
    n_k = N_p // t

    # Hold the feature operand fully resident (fetched once) when it fits.
    feat_resident = main_ws(t, feat_w, True, agg_first) <= budget

    cparams = pltpu.CompilerParams(
        dimension_semantics=("parallel", "arbitrary"),   # megacore rows, reduction last
        vmem_limit_bytes=budget,
    )

    if agg_first:
        kernel = functools.partial(_agg_linear_bias_relu_kernel,
                                   t=t, feat_resident=feat_resident)
        feat_spec = (pl.BlockSpec((N_p, in_p), lambda i, k: (0, 0)) if feat_resident
                     else pl.BlockSpec((t, in_p), lambda i, k: (k, 0)))
        in_specs = [
            pl.BlockSpec((t, t), lambda i, k: (i, k)),            # adj tile
            feat_spec,                                            # x (resident or tiled)
            pl.BlockSpec((in_p, out_p), lambda i, k: (0, 0)),     # W^T resident (bf16)
            pl.BlockSpec((1, out_p), lambda i, k: (0, 0)),        # bias
        ]
        operands = (adj_in, x_b, wt_b, b_p)
        scratch = [pltpu.VMEM((t, in_p), jnp.float32)]
        flops = 2 * N_p * N_p * in_p + 2 * N_p * in_p * out_p
        feat_bytes = N_p * in_p * 2 * (1 if feat_resident else n_row)
        bytes_accessed = (N_p * N_p * adj_esize + feat_bytes
                          + in_p * out_p * 2 + N_p * out_p * 4 + out_p * 4)
    else:
        # Small projection first (bf16, weight tiled over output columns to fit VMEM).
        oc = out_p
        for m in range(out_p // 128, 0, -1):
            oc = m * 128
            if out_p % oc:
                continue
            if 2 * (t * in_p * 2 + in_p * oc * 2 + t * oc * 2) <= budget:
                break
        xw = pl.pallas_call(
            _linear_kernel,
            out_shape=jax.ShapeDtypeStruct((N_p, out_p), bf16),
            grid=(n_row, out_p // oc),
            in_specs=[
                pl.BlockSpec((t, in_p), lambda i, j: (i, 0)),
                pl.BlockSpec((in_p, oc), lambda i, j: (0, j)),
            ],
            out_specs=pl.BlockSpec((t, oc), lambda i, j: (i, j)),
            compiler_params=pltpu.CompilerParams(
                dimension_semantics=("parallel", "parallel"),
                vmem_limit_bytes=budget),
        )(x_b, wt_b)

        kernel = functools.partial(_agg_bias_relu_kernel,
                                   t=t, feat_resident=feat_resident)
        feat_spec = (pl.BlockSpec((N_p, out_p), lambda i, k: (0, 0)) if feat_resident
                     else pl.BlockSpec((t, out_p), lambda i, k: (k, 0)))
        in_specs = [
            pl.BlockSpec((t, t), lambda i, k: (i, k)),            # adj tile
            feat_spec,                                            # xw (resident or tiled)
            pl.BlockSpec((1, out_p), lambda i, k: (0, 0)),        # bias
        ]
        operands = (adj_in, xw, b_p)
        scratch = []
        flops = 2 * N_p * N_p * out_p
        feat_bytes = N_p * out_p * 2 * (1 if feat_resident else n_row)
        bytes_accessed = (N_p * N_p * adj_esize + feat_bytes
                          + N_p * out_p * 4 + out_p * 4)

    out_padded = pl.pallas_call(
        kernel,
        out_shape=jax.ShapeDtypeStruct((N_p, out_p), f32),
        grid=(n_row, n_k),
        in_specs=in_specs,
        out_specs=pl.BlockSpec((t, out_p), lambda i, k: (i, 0)),   # resident across k
        scratch_shapes=scratch,
        compiler_params=cparams,
        cost_estimate=pl.CostEstimate(
            flops=int(flops), transcendentals=0,
            bytes_accessed=int(bytes_accessed)),
    )(*operands)

    return out_padded[:N, :out_feats]


if __name__ == "__main__":
    key = jax.random.PRNGKey(0)
    ks = jax.random.split(key, 12)

    def make_adj(k, n):
        a = (jax.random.uniform(k, (n, n)) > 0.5).astype(jnp.float32)
        a = jnp.clip(a + a.T + jnp.eye(n, dtype=jnp.float32), 0.0, 1.0)
        return a / jnp.sum(a, axis=-1, keepdims=True)

    def ref_fn(x, adj, w, b):
        return jnp.maximum(jnp.dot(jnp.dot(adj, x), w.T) + b, 0.0)

    # Case 1: module-scale shapes (N=8 nodes, in=16, out=32) -> linear-first path.
    N, fin, fout = 8, 16, 32
    x = jax.random.normal(ks[0], (N, fin), jnp.float32)
    adj = make_adj(ks[1], N)
    bound = 1.0 / math.sqrt(fin)
    w = jax.random.uniform(ks[2], (fout, fin), jnp.float32, -bound, bound)
    b = jax.random.uniform(ks[3], (fout,), jnp.float32, -bound, bound)
    out = jax.block_until_ready(gcn_layer(x, adj, w, b))
    ref = ref_fn(x, adj, w, b)
    assert out.shape == (N, fout)
    assert jnp.allclose(out, ref, atol=3e-2, rtol=3e-2), (
        f"case1 max abs err {float(jnp.max(jnp.abs(out - ref)))}")

    # Case 2: in_feats < out_feats after padding -> aggregate-first path.
    fin2, fout2 = 16, 200
    x2 = jax.random.normal(ks[4], (N, fin2), jnp.float32)
    w2 = jax.random.uniform(ks[5], (fout2, fin2), jnp.float32, -bound, bound)
    b2 = jax.random.uniform(ks[6], (fout2,), jnp.float32, -bound, bound)
    out2 = jax.block_until_ready(gcn_layer(x2, adj, w2, b2))
    ref2 = ref_fn(x2, adj, w2, b2)
    assert out2.shape == (N, fout2)
    assert jnp.allclose(out2, ref2, atol=3e-2, rtol=3e-2), (
        f"case2 max abs err {float(jnp.max(jnp.abs(out2 - ref2)))}")

    # Case 3: N already a multiple of 128 -> unpadded adj stream (in-kernel bf16 cast),
    # >=2 row tiles (megacore), VMEM-resident feature operand.
    N3, fin3, fout3 = 256, 64, 96
    x3 = jax.random.normal(ks[7], (N3, fin3), jnp.float32)
    adj3 = make_adj(ks[8], N3)
    bound3 = 1.0 / math.sqrt(fin3)
    w3 = jax.random.uniform(ks[9], (fout3, fin3), jnp.float32, -bound3, bound3)
    b3 = jax.random.uniform(ks[10], (fout3,), jnp.float32, -bound3, bound3)
    out3 = jax.block_until_ready(gcn_layer(x3, adj3, w3, b3))
    ref3 = ref_fn(x3, adj3, w3, b3)
    assert out3.shape == (N3, fout3)
    assert jnp.allclose(out3, ref3, atol=3e-2, rtol=3e-2), (
        f"case3 max abs err {float(jnp.max(jnp.abs(out3 - ref3)))}")

    print("KERNEL_OK")
</pallas_src>

<mosaic_0001>
module attributes {stable_mosaic.version = 11 : i64} {
  func.func @_linear_kernel(%arg0: i32, %arg1: i32, %arg2: memref<128x128xbf16, #tpu.memory_space<vmem>>, %arg3: memref<128x128xbf16, #tpu.memory_space<vmem>>, %arg4: memref<128x128xbf16, #tpu.memory_space<vmem>>) attributes {dimension_semantics = [#tpu.dimension_semantics<parallel>, #tpu.dimension_semantics<parallel>], iteration_bounds = array<i64: 1, 1>, scalar_prefetch = 0 : i64, scratch_operands = 0 : i64, tpu.core_type = #tpu.core_type<tc>, window_params = [{transform_indices = @transform_0, window_bounds = array<i64: 128, 128>}, {transform_indices = @transform_1, window_bounds = array<i64: 128, 128>}, {transform_indices = @transform_2, window_bounds = array<i64: 128, 128>}]} {
    %c0 = arith.constant 0 : index
    %c0_0 = arith.constant 0 : index
    %0 = vector.load %arg2[%c0, %c0_0] : memref<128x128xbf16, #tpu.memory_space<vmem>>, vector<128x128xbf16>
    %c0_1 = arith.constant 0 : index
    %c0_2 = arith.constant 0 : index
    %1 = vector.load %arg3[%c0_1, %c0_2] : memref<128x128xbf16, #tpu.memory_space<vmem>>, vector<128x128xbf16>
    %cst = arith.constant dense<0.000000e+00> : vector<128x128xf32>
    %2 = tpu.matmul %0, %1, %cst {dimension_numbers = #tpu.dot_dimension_numbers<[1], [0], [0], [1], [0, 0, 1, 1], [], []>} : vector<128x128xbf16>, vector<128x128xbf16>, vector<128x128xf32> -> vector<128x128xf32>
    %3 = arith.truncf %2 : vector<128x128xf32> to vector<128x128xbf16>
    %c0_3 = arith.constant 0 : index
    %c0_4 = arith.constant 0 : index
    %4 = vector.load %arg4[%c0_3, %c0_4] : memref<128x128xbf16, #tpu.memory_space<vmem>>, vector<128x128xbf16>
    tpu.vector_store %arg4[%c0_3, %c0_4], %3 {strides = array<i32>} : memref<128x128xbf16, #tpu.memory_space<vmem>>, vector<128x128xbf16>,
    return
  }
  func.func @transform_0(%arg0: i32, %arg1: i32) -> (i32, i32) {
    %c0_i32 = arith.constant 0 : i32
    %c0_i32_0 = arith.constant 0 : i32
    return %arg0, %c0_i32 : i32, i32
  }
  func.func @transform_1(%arg0: i32, %arg1: i32) -> (i32, i32) {
    %c0_i32 = arith.constant 0 : i32
    %c0_i32_0 = arith.constant 0 : i32
    return %c0_i32, %arg1 : i32, i32
  }
  func.func @transform_2(%arg0: i32, %arg1: i32) -> (i32, i32) {
    %c0_i32 = arith.constant 0 : i32
    return %arg0, %arg1 : i32, i32
  }
}

</mosaic_0001>

<bundles_post_ra>
// kernel: tpu_custom_call.1
= control target key start
LH: loop header
LB: loop body
LE: loop exit
PB: predicated region body
PF: predicated region fallthrough
CT: control target
= control target key end

     0   :  { %7 = vsyncpa [#allocation3], 0  ;;  %s648_s0 = inlined_call_operand.hbm [shape: bf16[128,128], index: 0, kind: input, shape index: {}]   ;;  %s649_s1 = inlined_call_operand.hbm [shape: bf16[128,128], index: 1, kind: input, shape index: {}]   ;;  %s650_s2 = inlined_call_operand.hbm [shape: bf16[128,128], index: 2, kind: output, shape index: {}]  }
   0x1   :  { %8 = vsyncpa [#allocation6], 0 }
   0x2   :  { %9 = vsyncpa [#allocation4], 0  ;;  %s610_s9 = smov [#allocation2]  }
   0x3   :  { %s15_s10 = sshll.u32 %s610_s9, 4  ;;  %s16_s10 = int_to_ptr.vmem [resolvable:$true] %s15_s10 }
   0x4   :  { %s552_s11 = scalar_lea.vmem %s16_s10, 1024  ;;  %p557_p1 = scmp.lt.s32.totalorder %s16_s10, %s16_s10 }
   0x5   :  { %p553_p0 = scmp.ne.s32.totalorder %s16_s10, %s552_s11  ;;  %p558_p2 = scmp.lt.s32.totalorder %s552_s11, %s552_s11 }
   0x7   :  { %p559_p3 = por %p558_p2, %p557_p1 }
   0x9   :  { %p560_p4 = pnand %p559_p3, %p553_p0 }
   0xb   :  { %563 = shalt.err (!%p560_p4)
}
   0xc   :  { %s611_s12 = smov 64   ;;  %s612_s13 = smov 4  }
   0xd   :  { %21 = dma.hbm_to_vmem [thread:$0]  %s648_s0, 1024, %s16_s10, [#allocation3], %s611_s12, %s611_s12, %s612_s13  }
   0xe   :  { %s613_s16 = smov [#allocation5]  }
   0xf   :  { %s27_s17 = sshll.u32 %s613_s16, 4  ;;  %s28_s17 = int_to_ptr.vmem [resolvable:$true] %s27_s17 }
  0x10   :  { %s572_s18 = scalar_lea.vmem %s28_s17, 1024  ;;  %p577_p6 = scmp.lt.s32.totalorder %s28_s17, %s28_s17 }
  0x11   :  { %p573_p5 = scmp.ne.s32.totalorder %s28_s17, %s572_s18  ;;  %p578_p7 = scmp.lt.s32.totalorder %s572_s18, %s572_s18 }
  0x13   :  { %p579_p8 = por %p578_p7, %p577_p6 }
  0x15   :  { %p580_p9 = pnand %p579_p8, %p573_p5 }
  0x17   :  { %583 = shalt.err (!%p580_p9)
}
  0x18   :  { %33 = dma.hbm_to_vmem [thread:$0]  %s649_s1, 1024, %s28_s17, [#allocation6], %s611_s12, %s611_s12, %s612_s13  }
  0x19   :  { %604 = dma.done.wait [#allocation3], 1024  }
  0x1a   :  { %605 = vsyncadd [#allocation3], 4294966272 }
  0x1b   :  { %606 = dma.done.wait [#allocation6], 1024  }
  0x1c   :  { %607 = vsyncadd [#allocation6], 4294966272  ;;  %v528_v0 = vld [vmem:[#allocation5 + $0x38] sm:$0xff]   ;;  %v529_v1 = vld [vmem:[#allocation5 + $0x30] sm:$0xff]   ;;  %s614_s0 = smov [#allocation7]  }
  0x1d   :  { %475 = vmatprep.subr.bf16.mxu0 %v528_v0  ;;  %507 = vmatprep.subr.bf16.mxu1 %v528_v0  ;;  %v530_v2 = vld [vmem:[#allocation5 + $0x28] sm:$0xff]   ;;  %v531_v3 = vld [vmem:[#allocation5 + $0x20] sm:$0xff]   ;;  %v532_v6 = vld [vmem:[#allocation5 + $0x18] sm:$0xff]   ;;  %s351_s1 = sshll.u32 %s614_s0, 4  ;;  %s352_s1 = int_to_ptr.vmem [resolvable:$true] %s351_s1 }
  0x1e   :  { %476 = vmatpush3.bf16.msra.mxu0 %v528_v0  ;;  %515 = vmatpush3.bf16.msra.mxu1 %v528_v0  ;;  %v536_v4 = vld [vmem:[#allocation2] sm:$0xff]   ;;  %v533_v7 = vld [vmem:[#allocation5 + $0x10] sm:$0xff]   ;;  %v534_v8 = vld [vmem:[#allocation5 + $0x8] sm:$0xff]   ;;  %s584_s21 = scalar_lea.vmem %s352_s1, 1024  ;;  %p589_p11 = scmp.lt.s32.totalorder %s352_s1, %s352_s1 }
  0x1f   :  { %477 = vmatprep.subr.bf16.mxu0 %v529_v1  ;;  %508 = vmatprep.subr.bf16.mxu1 %v529_v1  ;;  %v537_v5 = vld [vmem:[#allocation2 + $0x20] sm:$0xff]   ;;  %v538_v10 = vld [vmem:[#allocation2 + $0x8] sm:$0xff]   ;;  %v540_v12 = vld [vmem:[#allocation2 + $0x10] sm:$0xff]   ;;  %p585_p10 = scmp.ne.s32.totalorder %s352_s1, %s584_s21  ;;  %p590_p12 = scmp.lt.s32.totalorder %s584_s21, %s584_s21 }
  0x20   :  { %491 = vmatprep.mubr.bf16.mxu0 %v536_v4  ;;  %499 = vmatprep.mubr.bf16.mxu1 %v537_v5  ;;  %v535_v9 = vld [vmem:[#allocation5] sm:$0xff]   ;;  %v539_v11 = vld [vmem:[#allocation2 + $0x28] sm:$0xff]   ;;  %v541_v13 = vld [vmem:[#allocation2 + $0x30] sm:$0xff]  }
  0x21   :  { %v542_v14 = vld [vmem:[#allocation2 + $0x18] sm:$0xff]   ;;  %p591_p13 = por %p590_p12, %p589_p11 }
  0x22   :  { %478 = vmatpush3.bf16.msra.mxu0 %v529_v1  ;;  %516 = vmatpush3.bf16.msra.mxu1 %v529_v1  ;;  %v543_v15 = vld [vmem:[#allocation2 + $0x38] sm:$0xff]  }
  0x23   :  { %479 = vmatprep.subr.bf16.mxu0 %v530_v2  ;;  %509 = vmatprep.subr.bf16.mxu1 %v530_v2  ;;  %p592_p0 = pnand %p591_p13, %p585_p10 }
  0x26   :  { %480 = vmatpush3.bf16.msra.mxu0 %v530_v2  ;;  %517 = vmatpush3.bf16.msra.mxu1 %v530_v2 }
  0x27   :  { %481 = vmatprep.subr.bf16.mxu0 %v531_v3  ;;  %510 = vmatprep.subr.bf16.mxu1 %v531_v3 }
  0x2a   :  { %482 = vmatpush3.bf16.msra.mxu0 %v531_v3  ;;  %518 = vmatpush3.bf16.msra.mxu1 %v531_v3 }
  0x2b   :  { %483 = vmatprep.subr.bf16.mxu0 %v532_v6  ;;  %511 = vmatprep.subr.bf16.mxu1 %v532_v6 }
  0x2e   :  { %484 = vmatpush3.bf16.msra.mxu0 %v532_v6  ;;  %519 = vmatpush3.bf16.msra.mxu1 %v532_v6 }
  0x2f   :  { %485 = vmatprep.subr.bf16.mxu0 %v533_v7  ;;  %512 = vmatprep.subr.bf16.mxu1 %v533_v7 }
  0x32   :  { %486 = vmatpush3.bf16.msra.mxu0 %v533_v7  ;;  %520 = vmatpush3.bf16.msra.mxu1 %v533_v7 }
  0x33   :  { %487 = vmatprep.subr.bf16.mxu0 %v534_v8  ;;  %513 = vmatprep.subr.bf16.mxu1 %v534_v8 }
  0x36   :  { %488 = vmatpush3.bf16.msra.mxu0 %v534_v8  ;;  %521 = vmatpush3.bf16.msra.mxu1 %v534_v8 }
  0x37   :  { %489 = vmatprep.subr.bf16.mxu0 %v535_v9  ;;  %514 = vmatprep.subr.bf16.mxu1 %v535_v9 }
  0x3a   :  { %490 = vmatpush3.bf16.msra.mxu0 %v535_v9  ;;  %522 = vmatpush3.bf16.msra.mxu1 %v535_v9 }
  0x3d   :  { %492 = vmatmul.mubr.bf16.vlgmr.msra.gmra.mxu0 %v538_v10  ;;  %500 = vmatmul.mubr.bf16.vlgmr.msra.gmra.mxu1 %v539_v11 }
  0x3e   :  { %495 = vmatprep.mubr.bf16.mxu0 %v540_v12  ;;  %503 = vmatprep.mubr.bf16.mxu1 %v541_v13 }
  0x45   :  { %496 = vmatmul.mubr.bf16.gmra.mxu0 %v542_v14  ;;  %504 = vmatmul.mubr.bf16.gmra.mxu1 %v543_v15 }
  0xfd   :  { %v493_v16 = vpop.f32.mrf.mxu0  ;;  %v501_v17 = vpop.f32.mrf.mxu1 }
  0xff   :  { %v203_v18 = vpop.f32.mrf.mxu0  ;;  %v235_v19 = vpop.f32.mrf.mxu1 }
 0x101   :  { %v494_v20 = vpop.f32.mrf.mxu0  ;;  %v502_v21 = vpop.f32.mrf.mxu1 }
 0x102   :  { %v420_v22 = vpack.c.bf16 %v494_v20, %v493_v16  ;;  %v440_v23 = vpack.c.bf16 %v502_v21, %v501_v17 }
 0x103   :  { %v206_v24 = vpop.f32.mrf.mxu0  ;;  %v238_v25 = vpop.f32.mrf.mxu1 }
 0x104   :  { %452 = vst [vmem:[#allocation7 + $0x8] sm:$0xff] %v420_v22   ;;  %456 = vst [vmem:[#allocation7 + $0x28] sm:$0xff] %v440_v23   ;;  %v415_v26 = vpack.c.bf16 %v206_v24, %v203_v18  ;;  %v435_v27 = vpack.c.bf16 %v238_v25, %v235_v19 }
 0x105   :  { %v497_v28 = vpop.f32.mrf.mxu0  ;;  %v505_v29 = vpop.f32.mrf.mxu1 }
 0x106   :  { %416 = vst [vmem:[#allocation7] sm:$0xff] %v415_v26   ;;  %455 = vst [vmem:[#allocation7 + $0x20] sm:$0xff] %v435_v27  }
 0x107   :  { %v219_v30 = vpop.f32.mrf.mxu0  ;;  %v251_v31 = vpop.f32.mrf.mxu1 }
 0x109   :  { %v498_v32 = vpop.f32.mrf.mxu0  ;;  %v506_v33 = vpop.f32.mrf.mxu1 }
 0x10a   :  { %v430_v34 = vpack.c.bf16 %v498_v32, %v497_v28  ;;  %v450_v35 = vpack.c.bf16 %v506_v33, %v505_v29 }
 0x10b   :  { %v222_v36 = vpop.f32.mrf.mxu0  ;;  %v254_v37 = vpop.f32.mrf.mxu1 }
 0x10c   :  { %454 = vst [vmem:[#allocation7 + $0x18] sm:$0xff] %v430_v34   ;;  %458 = vst [vmem:[#allocation7 + $0x38] sm:$0xff] %v450_v35   ;;  %v425_v38 = vpack.c.bf16 %v222_v36, %v219_v30  ;;  %v445_v39 = vpack.c.bf16 %v254_v37, %v251_v31 }
 0x10e   :  { %453 = vst [vmem:[#allocation7 + $0x10] sm:$0xff] %v425_v38   ;;  %457 = vst [vmem:[#allocation7 + $0x30] sm:$0xff] %v445_v39  }
 0x10f   :  { %595 = shalt.err (!%p592_p0)
}
 0x110   :  { %357 = dma.vmem_to_hbm [thread:$0]  %s352_s1, 1024, %s650_s2, [#allocation4], %s611_s12, %s611_s12, %s612_s13  }
 0x111   :  { %608 = dma.done.wait [#allocation4], 1024  }
 0x112   :  { %609 = vsyncadd [#allocation4], 4294966272 }
 0x113   :  { %361 = vsyncpa [#allocation3], 1 }
 0x114   :  { %362 = vsyncpa [#allocation6], 1 }
 0x115   :  { %363 = vsyncpa [#allocation4], 1 }

</bundles_post_ra>
